<compile_context>
chip_gen: v7x
topology: tpu7x:2x2x1
jax: 0.10.0
libtpu: 0.0.40
codegen_flags: <defaults>
</compile_context>

<pallas_src>
import functools
import numpy as np
import jax
import jax.numpy as jnp
from jax.experimental import pallas as pl
from jax.experimental.pallas import tpu as pltpu

N_BINS = 15
LANE = 128
# deterministic "parameters" of the module: bin boundaries linspace(0, 1, 16)
_BIN_BOUNDARIES = np.linspace(0.0, 1.0, N_BINS + 1, dtype=np.float32)
_BIN_LOWERS = _BIN_BOUNDARIES[:-1]
_BIN_UPPERS = _BIN_BOUNDARIES[1:]


def _round_up(x, m):
    return ((x + m - 1) // m) * m


def _ece_kernel(logits_ref, labels_ref, lo_ref, hi_ref, out_ref, acc_ref, *, n_valid):
    """Processes one (TN, C) row tile and accumulates per-bin sum(conf - acc)."""
    pid = pl.program_id(0)

    @pl.when(pid == 0)
    def _init():
        acc_ref[...] = jnp.zeros_like(acc_ref)

    x = logits_ref[...].astype(jnp.float32)                 # (TN, C)
    tn, c = x.shape

    # softmax is monotonic: confidence = 1 / sum(exp(x - max)); prediction = argmax(x).
    m = jnp.max(x, axis=1, keepdims=True)                   # (TN, 1)
    s = jnp.sum(jnp.exp(x - m), axis=1, keepdims=True)      # (TN, 1)
    conf = 1.0 / s                                          # == max softmax prob (exact)

    col = jax.lax.broadcasted_iota(jnp.int32, (tn, c), 1)
    pred = jnp.min(jnp.where(x == m, col, c), axis=1, keepdims=True)   # first-occurrence argmax

    correct = (pred == labels_ref[...]).astype(jnp.float32)            # (TN, 1)

    # Mask rows that are only padding (N rounded up to a multiple of the row tile).
    row = pid * tn + jax.lax.broadcasted_iota(jnp.int32, (tn, 1), 0)
    valid = (row < n_valid).astype(jnp.float32)

    d = (conf - correct) * valid                             # (TN, 1) signed contribution

    # Single-pass binning: (TN, 128) membership mask; pad lanes have bounds > 1 so never match.
    in_bin = jnp.logical_and(conf > lo_ref[...], conf <= hi_ref[...]).astype(jnp.float32)
    acc_ref[...] += jnp.sum(in_bin * d, axis=0, keepdims=True)          # (1, 128)

    @pl.when(pid == pl.num_programs(0) - 1)
    def _finalize():
        tot = jnp.sum(jnp.abs(acc_ref[...]), axis=1, keepdims=True)     # (1, 1)
        out_ref[...] = tot / jnp.float32(n_valid)


def ece_loss(logits, labels, *, row_tile=512):
    """logits: [N, C] (any float dtype), labels: [N] int. Returns shape (1,) float32 ECE."""
    n, c = logits.shape
    labels2d = labels.astype(jnp.int32).reshape(n, 1)

    tn = min(row_tile, _round_up(n, 8))        # tile rows (multiple of 8 sublanes)
    n_pad = _round_up(n, tn)
    if n_pad != n:
        logits = jnp.pad(logits, ((0, n_pad - n), (0, 0)))
        labels2d = jnp.pad(labels2d, ((0, n_pad - n), (0, 0)))

    # Bin boundaries padded to a full 128-lane vector; pad lanes can never match conf <= 1.
    lo = np.full((1, LANE), 2.0, np.float32)
    hi = np.full((1, LANE), 2.0, np.float32)
    lo[0, :N_BINS] = _BIN_LOWERS
    hi[0, :N_BINS] = _BIN_UPPERS

    grid = (n_pad // tn,)
    out = pl.pallas_call(
        functools.partial(_ece_kernel, n_valid=n),
        out_shape=jax.ShapeDtypeStruct((1, 1), jnp.float32),
        grid_spec=pltpu.PrefetchScalarGridSpec(
            num_scalar_prefetch=0,
            grid=grid,
            in_specs=[
                pl.BlockSpec((tn, c), lambda i: (i, 0)),       # logits row tile
                pl.BlockSpec((tn, 1), lambda i: (i, 0)),       # labels row tile
                pl.BlockSpec((1, LANE), lambda i: (0, 0)),     # bin lowers (replicated)
                pl.BlockSpec((1, LANE), lambda i: (0, 0)),     # bin uppers (replicated)
            ],
            out_specs=pl.BlockSpec((1, 1), lambda i: (0, 0)),
            scratch_shapes=[pltpu.VMEM((1, LANE), jnp.float32)],   # per-bin accumulator
        ),
        compiler_params=pltpu.CompilerParams(
            dimension_semantics=("arbitrary",),   # carried reduction across row tiles
        ),
    )(logits, labels2d, jnp.asarray(lo), jnp.asarray(hi))
    return out.reshape(1)


def _ece_reference(logits, labels):
    """Pure-JAX reference mirroring the PyTorch module."""
    p = jax.nn.softmax(logits.astype(jnp.float32), axis=1)
    conf = jnp.max(p, axis=1)
    pred = jnp.argmax(p, axis=1)
    acc = (pred == labels).astype(jnp.float32)
    n = conf.shape[0]
    ece = jnp.zeros((1,), jnp.float32)
    for lo, hi in zip(_BIN_LOWERS, _BIN_UPPERS):
        in_bin = (conf > lo) & (conf <= hi)
        cnt = jnp.sum(in_bin.astype(jnp.float32))
        prop = cnt / n
        safe = jnp.where(cnt > 0, cnt, 1.0)
        avg_acc = jnp.sum(acc * in_bin) / safe
        avg_conf = jnp.sum(conf * in_bin) / safe
        ece = ece + jnp.where(cnt > 0, jnp.abs(avg_conf - avg_acc) * prop, 0.0)
    return ece


if __name__ == "__main__":
    key = jax.random.PRNGKey(0)
    k1, k2 = jax.random.split(key)
    N, C = 70, 16                       # N not a multiple of the tile -> exercises padding/masking
    logits = jax.random.normal(k1, (N, C), dtype=jnp.float32) * 3.0
    labels = jax.random.randint(k2, (N,), 0, C, dtype=jnp.int32)

    out = ece_loss(logits, labels, row_tile=32)   # grid of 3 row tiles + 26 masked pad rows
    jax.block_until_ready(out)

    ref = _ece_reference(logits, labels)
    np.testing.assert_allclose(np.asarray(out), np.asarray(ref), atol=1e-5, rtol=1e-5)

    print("KERNEL_OK")
</pallas_src>

<mosaic_0001>
module attributes {stable_mosaic.version = 11 : i64} {
  func.func @_ece_kernel(%arg0: i32, %arg1: memref<32x16xf32, #tpu.memory_space<vmem>>, %arg2: memref<32x1xi32, #tpu.memory_space<vmem>>, %arg3: memref<1x128xf32, #tpu.memory_space<vmem>>, %arg4: memref<1x128xf32, #tpu.memory_space<vmem>>, %arg5: memref<1x1xf32, #tpu.memory_space<vmem>>, %arg6: memref<1x128xf32, #tpu.memory_space<vmem>>) attributes {dimension_semantics = [#tpu.dimension_semantics<arbitrary>], iteration_bounds = array<i64: 3>, scalar_prefetch = 0 : i64, scratch_operands = 1 : i64, tpu.core_type = #tpu.core_type<tc>, window_params = [{transform_indices = @transform_0, window_bounds = array<i64: 32, 16>}, {transform_indices = @transform_1, window_bounds = array<i64: 32, 1>}, {pipeline_mode = #tpu.pipeline_mode<synchronous>, transform_indices = @transform_2, window_bounds = array<i64: 1, 128>}, {pipeline_mode = #tpu.pipeline_mode<synchronous>, transform_indices = @transform_3, window_bounds = array<i64: 1, 128>}, {pipeline_mode = #tpu.pipeline_mode<synchronous>, transform_indices = @transform_4, window_bounds = array<i64: 1, 1>}]} {
    %c0_i32 = arith.constant 0 : i32
    %0 = arith.cmpi eq, %arg0, %c0_i32 : i32
    %1 = arith.extui %0 : i1 to i32
    %c0_i32_0 = arith.constant 0 : i32
    %2 = arith.cmpi ne, %1, %c0_i32_0 : i32
    scf.if %2 {
      %cst_17 = arith.constant 0.000000e+00 : f32
      %55 = vector.broadcast %cst_17 : f32 to vector<1x128xf32>
      %c0_18 = arith.constant 0 : index
      %c0_19 = arith.constant 0 : index
      %56 = vector.load %arg6[%c0_18, %c0_19] : memref<1x128xf32, #tpu.memory_space<vmem>>, vector<1x128xf32>
      tpu.vector_store %arg6[%c0_18, %c0_19], %55 {strides = array<i32>} : memref<1x128xf32, #tpu.memory_space<vmem>>, vector<1x128xf32>,
    } else {
    }
    %c0 = arith.constant 0 : index
    %c0_1 = arith.constant 0 : index
    %3 = vector.load %arg1[%c0, %c0_1] : memref<32x16xf32, #tpu.memory_space<vmem>>, vector<32x16xf32>
    %cst = arith.constant dense<0xFF800000> : vector<32xf32>
    %4 = vector.multi_reduction <maximumf>, %3, %cst [1] : vector<32x16xf32> to vector<32xf32>
    %5 = vector.shape_cast %4 : vector<32xf32> to vector<32x1xf32>
    %6 = vector.broadcast %5 : vector<32x1xf32> to vector<32x16xf32>
    %7 = arith.subf %3, %6 : vector<32x16xf32>
    %8 = math.exp %7 : vector<32x16xf32>
    %cst_2 = arith.constant dense<0.000000e+00> : vector<32xf32>
    %9 = vector.multi_reduction <add>, %8, %cst_2 [1] : vector<32x16xf32> to vector<32xf32>
    %10 = vector.shape_cast %9 : vector<32xf32> to vector<32x1xf32>
    %cst_3 = arith.constant 1.000000e+00 : f32
    %11 = vector.broadcast %cst_3 : f32 to vector<32x1xf32>
    %12 = arith.divf %11, %10 : vector<32x1xf32>
    %13 = tpu.iota {dimensions = array<i32: 1>} : vector<32x16xi32>
    %14 = vector.broadcast %5 : vector<32x1xf32> to vector<32x16xf32>
    %15 = arith.cmpf oeq, %3, %14 : vector<32x16xf32>
    %c16_i32 = arith.constant 16 : i32
    %16 = vector.broadcast %c16_i32 : i32 to vector<32x16xi32>
    %17 = arith.select %15, %13, %16 : vector<32x16xi1>, vector<32x16xi32>
    %cst_4 = arith.constant dense<2147483647> : vector<32xi32>
    %18 = vector.multi_reduction <minsi>, %17, %cst_4 [1] : vector<32x16xi32> to vector<32xi32>
    %19 = vector.shape_cast %18 : vector<32xi32> to vector<32x1xi32>
    %c0_5 = arith.constant 0 : index
    %c0_6 = arith.constant 0 : index
    %20 = vector.load %arg2[%c0_5, %c0_6] : memref<32x1xi32, #tpu.memory_space<vmem>>, vector<32x1xi32>
    %21 = arith.cmpi eq, %19, %20 : vector<32x1xi32>
    %22 = arith.extui %21 : vector<32x1xi1> to vector<32x1xi32>
    %23 = arith.sitofp %22 : vector<32x1xi32> to vector<32x1xf32>
    %c32_i32 = arith.constant 32 : i32
    %24 = arith.muli %arg0, %c32_i32 : i32
    %25 = tpu.iota {dimensions = array<i32: 0>} : vector<32x1xi32>
    %26 = vector.broadcast %24 : i32 to vector<32x1xi32>
    %27 = arith.addi %26, %25 : vector<32x1xi32>
    %c70_i32 = arith.constant 70 : i32
    %28 = vector.broadcast %c70_i32 : i32 to vector<32x1xi32>
    %29 = arith.cmpi slt, %27, %28 : vector<32x1xi32>
    %30 = arith.extui %29 : vector<32x1xi1> to vector<32x1xi32>
    %31 = arith.sitofp %30 : vector<32x1xi32> to vector<32x1xf32>
    %32 = arith.subf %12, %23 : vector<32x1xf32>
    %33 = arith.mulf %32, %31 : vector<32x1xf32>
    %c0_7 = arith.constant 0 : index
    %c0_8 = arith.constant 0 : index
    %34 = vector.load %arg3[%c0_7, %c0_8] : memref<1x128xf32, #tpu.memory_space<vmem>>, vector<1x128xf32>
    %35 = vector.broadcast %12 : vector<32x1xf32> to vector<32x128xf32>
    %36 = vector.broadcast %34 : vector<1x128xf32> to vector<32x128xf32>
    %37 = arith.cmpf ogt, %35, %36 : vector<32x128xf32>
    %c0_9 = arith.constant 0 : index
    %c0_10 = arith.constant 0 : index
    %38 = vector.load %arg4[%c0_9, %c0_10] : memref<1x128xf32, #tpu.memory_space<vmem>>, vector<1x128xf32>
    %39 = vector.broadcast %12 : vector<32x1xf32> to vector<32x128xf32>
    %40 = vector.broadcast %38 : vector<1x128xf32> to vector<32x128xf32>
    %41 = arith.cmpf ole, %39, %40 : vector<32x128xf32>
    %42 = arith.andi %37, %41 : vector<32x128xi1>
    %43 = arith.extui %42 : vector<32x128xi1> to vector<32x128xi32>
    %44 = arith.sitofp %43 : vector<32x128xi32> to vector<32x128xf32>
    %c0_11 = arith.constant 0 : index
    %c0_12 = arith.constant 0 : index
    %45 = vector.load %arg6[%c0_11, %c0_12] : memref<1x128xf32, #tpu.memory_space<vmem>>, vector<1x128xf32>
    %46 = vector.broadcast %33 : vector<32x1xf32> to vector<32x128xf32>
    %47 = arith.mulf %44, %46 : vector<32x128xf32>
    %cst_13 = arith.constant dense<0.000000e+00> : vector<128xf32>
    %48 = vector.multi_reduction <add>, %47, %cst_13 [0] : vector<32x128xf32> to vector<128xf32>
    %49 = vector.shape_cast %48 : vector<128xf32> to vector<1x128xf32>
    %50 = arith.addf %45, %49 : vector<1x128xf32>
    %c0_14 = arith.constant 0 : index
    %c0_15 = arith.constant 0 : index
    %51 = vector.load %arg6[%c0_14, %c0_15] : memref<1x128xf32, #tpu.memory_space<vmem>>, vector<1x128xf32>
    tpu.vector_store %arg6[%c0_14, %c0_15], %50 {strides = array<i32>} : memref<1x128xf32, #tpu.memory_space<vmem>>, vector<1x128xf32>,
    %c2_i32 = arith.constant 2 : i32
    %52 = arith.cmpi eq, %arg0, %c2_i32 : i32
    %53 = arith.extui %52 : i1 to i32
    %c0_i32_16 = arith.constant 0 : i32
    %54 = arith.cmpi ne, %53, %c0_i32_16 : i32
    scf.if %54 {
      %c0_17 = arith.constant 0 : index
      %c0_18 = arith.constant 0 : index
      %55 = vector.load %arg6[%c0_17, %c0_18] : memref<1x128xf32, #tpu.memory_space<vmem>>, vector<1x128xf32>
      %56 = math.absf %55 : vector<1x128xf32>
      %cst_19 = arith.constant dense<0.000000e+00> : vector<1xf32>
      %57 = vector.multi_reduction <add>, %56, %cst_19 [1] : vector<1x128xf32> to vector<1xf32>
      %58 = vector.shape_cast %57 : vector<1xf32> to vector<1x1xf32>
      %cst_20 = arith.constant 7.000000e+01 : f32
      %59 = vector.broadcast %cst_20 : f32 to vector<1x1xf32>
      %60 = arith.divf %58, %59 : vector<1x1xf32>
      %c0_21 = arith.constant 0 : index
      %c0_22 = arith.constant 0 : index
      %61 = vector.load %arg5[%c0_21, %c0_22] : memref<1x1xf32, #tpu.memory_space<vmem>>, vector<1x1xf32>
      tpu.vector_store %arg5[%c0_21, %c0_22], %60 {strides = array<i32>} : memref<1x1xf32, #tpu.memory_space<vmem>>, vector<1x1xf32>,
    } else {
    }
    return
  }
  func.func @transform_0(%arg0: i32) -> (i32, i32) {
    %c0_i32 = arith.constant 0 : i32
    %c0_i32_0 = arith.constant 0 : i32
    return %arg0, %c0_i32 : i32, i32
  }
  func.func @transform_1(%arg0: i32) -> (i32, i32) {
    %c0_i32 = arith.constant 0 : i32
    %c0_i32_0 = arith.constant 0 : i32
    return %arg0, %c0_i32 : i32, i32
  }
  func.func @transform_2(%arg0: i32) -> (i32, i32) {
    %c0_i32 = arith.constant 0 : i32
    %c0_i32_0 = arith.constant 0 : i32
    %c0_i32_1 = arith.constant 0 : i32
    return %c0_i32, %c0_i32_0 : i32, i32
  }
  func.func @transform_3(%arg0: i32) -> (i32, i32) {
    %c0_i32 = arith.constant 0 : i32
    %c0_i32_0 = arith.constant 0 : i32
    %c0_i32_1 = arith.constant 0 : i32
    return %c0_i32, %c0_i32_0 : i32, i32
  }
  func.func @transform_4(%arg0: i32) -> (i32, i32) {
    %c0_i32 = arith.constant 0 : i32
    %c0_i32_0 = arith.constant 0 : i32
    %c0_i32_1 = arith.constant 0 : i32
    return %c0_i32, %c0_i32_0 : i32, i32
  }
}

</mosaic_0001>

<bundles_post_ra>
// kernel: tpu_custom_call.1
= control target key start
LH: loop header
LB: loop body
LE: loop exit
PB: predicated region body
PF: predicated region fallthrough
CT: control target
= control target key end

     0   :  { %9 = vsyncpa [#allocation4], 0  ;;  %s653_s15 = smov 0   ;;  %s737_s0 = inlined_call_operand.vmem [shape: f32[96,16], index: 0, kind: input, shape index: {}]   ;;  %s738_s1 = inlined_call_operand.vmem [shape: s32[96,1], index: 1, kind: input, shape index: {}]   ;;  %s739_s2 = inlined_call_operand.vmem [shape: f32[1,128], index: 2, kind: input, shape index: {}]   ;;  %s740_s3 = inlined_call_operand.vmem [shape: f32[1,128], index: 3, kind: input, shape index: {}]   ;;  %s741_s4 = inlined_call_operand.hbm [shape: f32[1,1], index: 4, kind: output, shape index: {}]  }
   0x1 LB: > { %s659_s16 = sadd.s32 4294967295, %s622_s15   ;;  %p524_p0 = scmp.ge.s32.totalorder %s622_s15, 1  ;;  %s622_s15 = sphi %s653_s15, %s15_s15  }
   0x2   : > { %p170_p1 = scmp.lt.s32.totalorder %s622_s15, 4 }
   0x4   : > { %p171_p2 = pnand %p524_p0, %p170_p1 }
   0x5   : > { %s525_s17 = sshll.u32 (!%p171_p2), %s659_s16, 2  ;;  %p529_p4 = scmp.ne.s32.totalorder (!%p171_p2), %s659_s16, 0 }
   0x6   : > { %174 = sbr.rel (%p171_p2) target bundleno = 807 (0x327), region = 36  ;;  %p197_p3 = scmp.lt.s32.totalorder (!%p171_p2), %s525_s17, 11 }
   0xd   : > { %s743_s17 = smov (!%p197_p3, %s525_s17), 11  ;;  %211 = sbr.rel (%p529_p4) target bundleno = 20 (0x14), region = 40 }
   0xe   : > { %s526_s18 = sshll.u32 %s743_s17, 3  ;;  %v624_v0 = vmov (!%p529_p4), 0.0  }
   0xf   : > { %s200_s21 = scalar_lea.vmem %s737_s0, %s526_s18  ;;  %s670_s24 = scalar_lea.vmem %s738_s1, %s526_s18  ;;  %212 = vst [vmem:[#allocation2] sm:$0x1] (!%p529_p4), %v624_v0 }
  0x14 PF: > { %v213_v1 = vld [vmem:[%s200_s21] sm:$0xff]  ;;  %vm217_vm0 = vcmask 130048   ;;  %v215_v2 = vld [vmem:[%s200_s21 + $0x10] sm:$0xff]  ;;  %v214_v3 = vld [vmem:[%s200_s21 + $0x8] sm:$0xff]  ;;  %v262_v9 = vlaneseq  ;;  %v625_v63 = vmov 0   ;;  %s534_s25 = sshll.u32 %s659_s16, 5 }
  0x15   : > { %v218_v4 = vsel %vm217_vm0, %v213_v1, -inf  ;;  %v224_v5 = vsel %vm217_vm0, %v215_v2, -inf  ;;  %v216_v6 = vld [vmem:[%s200_s21 + $0x18] sm:$0xff]  ;;  %v221_v7 = vsel %vm217_vm0, %v214_v3, -inf  ;;  %568 = vset.pattern.permute.xlu0 %v625_v63  ;;  %569 = vset.pattern.permute.xlu1 %v625_v63  ;;  %p545_p5 = scmp.ne.s32.totalorder %s659_s16, 2 }
  0x16   : > { %219 = vmax.xlane.f32.xlu0 %v218_v4  ;;  %225 = vmax.xlane.f32.xlu1 %v224_v5  ;;  %v227_v8 = vsel %vm217_vm0, %v216_v6, -inf  ;;  %v263_v10 = vand.u32 127, %v262_v9  ;;  %v354_v4 = vstv %s534_s25 }
  0x1a   : > { %222 = vmax.xlane.f32.xlu0 %v221_v7  ;;  %228 = vmax.xlane.f32.xlu1 %v227_v8 }
  0xa3   : > { %v220_v11 = vpop.xlane.xlu0 %219  ;;  %v226_v12 = vpop.xlane.xlu1 %225 }
  0xa4   : > { %v230_v13 = vsub.f32 %v213_v1, %v220_v11  ;;  %vm264_vm1 = vcmp.eq.f32.partialorder %v213_v1, %v220_v11  ;;  %v232_v14 = vsub.f32 %v215_v2, %v226_v12  ;;  %vm266_vm2 = vcmp.eq.f32.partialorder %v215_v2, %v226_v12 }
  0xa5   : > { %v268_v15 = vsel %vm264_vm1, %v263_v10, 16  ;;  %v270_v16 = vsel %vm266_vm2, %v263_v10, 16  ;;  %v350_v1 = vshrl.u32 %v262_v9, 7 }
  0xa6   : > { %v234_v17 = vmul.f32 1.442695, %v230_v13  ;;  %v238_v18 = vmul.f32 1.442695, %v232_v14  ;;  %v272_v19 = vsel %vm217_vm0, %v268_v15, 2147483647 }
  0xa7   : > { %v223_v20 = vpop.xlane.xlu0 %222  ;;  %v229_v21 = vpop.xlane.xlu1 %228  ;;  %v274_v22 = vshra.s32 %v272_v19, 16  ;;  %v302_v23 = vsel %vm217_vm0, %v270_v16, 2147483647  ;;  %v273_v47 = vand.u32 65535, %v272_v19  ;;  %v332_v15 = vld [vmem:[%s670_s24] sm:$0xff] }
  0xa8   : > { %570 = vpow2.f32 %v234_v17  ;;  %v231_v24 = vsub.f32 %v214_v3, %v223_v20  ;;  %vm265_vm3 = vcmp.eq.f32.partialorder %v214_v3, %v223_v20  ;;  %v233_v25 = vsub.f32 %v216_v6, %v229_v21 }
  0xa9   : > { %572 = vpow2.f32 %v238_v18  ;;  %v269_v26 = vsel %vm265_vm3, %v263_v10, 16  ;;  %vm267_vm4 = vcmp.eq.f32.partialorder %v216_v6, %v229_v21  ;;  %v276_v27 = vcvt.s32.f32 %v274_v22 }
  0xaa   : > { %v236_v28 = vmul.f32 1.442695, %v231_v24  ;;  %v240_v29 = vmul.f32 1.442695, %v233_v25  ;;  %v271_v30 = vsel %vm267_vm4, %v263_v10, 16  ;;  %v304_v31 = vshra.s32 %v302_v23, 16 }
  0xab   : > { %277 = vmin.xlane.f32.xlu0 %v276_v27  ;;  %v287_v32 = vsel %vm217_vm0, %v269_v26, 2147483647  ;;  %v317_v33 = vsel %vm217_vm0, %v271_v30, 2147483647  ;;  %v275_v49 = vcvt.s32.f32 %v273_v47  ;;  %v303_v50 = vand.u32 65535, %v302_v23  ;;  %v333_v30 = vld [vmem:[%s670_s24 + $0x8] sm:$0xff] }
  0xac   : > { %574 = vpow2.f32 %v236_v28  ;;  %v306_v34 = vcvt.s32.f32 %v304_v31  ;;  %v289_v35 = vshra.s32 %v287_v32, 16  ;;  %v319_v36 = vshra.s32 %v317_v33, 16  ;;  %v334_v28 = vld [vmem:[%s670_s24 + $0x10] sm:$0xff] }
  0xad   : > { %576 = vpow2.f32 %v240_v29  ;;  %v288_v51 = vand.u32 65535, %v287_v32  ;;  %v305_v54 = vcvt.s32.f32 %v303_v50  ;;  %v318_v57 = vand.u32 65535, %v317_v33 }
  0xae   : > { %v291_v37 = vcvt.s32.f32 %v289_v35  ;;  %v321_v38 = vcvt.s32.f32 %v319_v36  ;;  %v355_v6 = vadd.s32 %v354_v4, %v350_v1  ;;  %v351_v10 = vadd.s32 8, %v350_v1 }
  0xaf   : > { %307 = vmin.xlane.f32.xlu0 %v306_v34  ;;  %v290_v56 = vcvt.s32.f32 %v288_v51  ;;  %v320_v61 = vcvt.s32.f32 %v318_v57  ;;  %v352_v18 = vadd.s32 16, %v350_v1  ;;  %v626_v25 = vmov 0.0  }
  0xb0   : > { %292 = vmin.xlane.f32.xlu1 %v291_v37  ;;  %vm359_vm9 = vcmp.lt.s32.totalorder %v355_v6, 70  ;;  %v356_v17 = vadd.s32 %v354_v4, %v351_v10  ;;  %v353_v35 = vadd.s32 24, %v350_v1 }
  0xb1   : > { %v535_v29 = vsel %vm359_vm9, 1.0, %v626_v25 }
  0xb2   : > { %v571_v39 = vpop.eup %570  ;;  %vm360_vm11 = vcmp.lt.s32.totalorder %v356_v17, 70  ;;  %v358_v47 = vadd.s32 %v354_v4, %v353_v35 }
  0xb3   : > { %v573_v40 = vpop.eup %572  ;;  %v242_v41 = vsel %vm217_vm0, %v571_v39, 0.0 }
  0xb4   : > { %322 = vmin.xlane.f32.xlu1 %v321_v38  ;;  %243 = vadd.xlane.f32.xlu0 %v242_v41  ;;  %v248_v42 = vsel %vm217_vm0, %v573_v40, 0.0 }
  0xb6   : > { %v575_v43 = vpop.eup %574 }
  0xb7   : > { %v577_v44 = vpop.eup %576  ;;  %v245_v45 = vsel %vm217_vm0, %v575_v43, 0.0  ;;  %v335_v43 = vld [vmem:[%s670_s24 + $0x18] sm:$0xff] }
  0xb8   : > { %246 = vadd.xlane.f32.xlu1 %v245_v45  ;;  %249 = vadd.xlane.f32.xlu0 %v248_v42  ;;  %v251_v46 = vsel %vm217_vm0, %v577_v44, 0.0  ;;  %v536_v44 = vsel %vm360_vm11, 1.0, %v626_v25  ;;  %vm362_vm0 = vcmp.lt.s32.totalorder %v358_v47, 70 }
  0xbc   : > { %252 = vadd.xlane.f32.xlu1 %v251_v46 }
 0x138   : > { %v278_v48 = vpop.xlane.xlu0 %277 }
 0x139   : > { %vm279_vm5 = vcmp.eq.f32.partialorder %v276_v27, %v278_v48  ;;  %v284_v2 = vcvt.f32.s32 %v278_v48 }
 0x13a   : > { %v280_v52 = vsel %vm279_vm5, %v275_v49, inf }
 0x13b   : > { %281 = vmin.xlane.f32.xlu0 %v280_v52  ;;  %v285_v7 = vshll.u32 %v284_v2, 16 }
 0x13c   : > { %v308_v53 = vpop.xlane.xlu0 %307 }
 0x13d   : > { %v293_v55 = vpop.xlane.xlu1 %292  ;;  %vm309_vm6 = vcmp.eq.f32.partialorder %v306_v34, %v308_v53  ;;  %v314_v12 = vcvt.f32.s32 %v308_v53  ;;  %v357_v34 = vadd.s32 %v354_v4, %v352_v18 }
 0x13e   : > { %vm294_vm7 = vcmp.eq.f32.partialorder %v291_v37, %v293_v55  ;;  %v310_v58 = vsel %vm309_vm6, %v305_v54, inf  ;;  %v299_v11 = vcvt.f32.s32 %v293_v55 }
 0x13f   : > { %v295_v59 = vsel %vm294_vm7, %v290_v56, inf  ;;  %311 = vmin.xlane.f32.xlu0 %v310_v58  ;;  %v315_v20 = vshll.u32 %v314_v12, 16  ;;  %vm361_vm14 = vcmp.lt.s32.totalorder %v357_v34, 70  ;;  %v538_v56 = vsel %vm362_vm0, 1.0, %v626_v25  ;;  %v539_v58 = vld [vmem:[%s739_s2] ss:$0 sm:$0xff] }
 0x140   : > { %296 = vmin.xlane.f32.xlu1 %v295_v59  ;;  %v300_v19 = vshll.u32 %v299_v11, 16  ;;  %v537_v52 = vsel %vm361_vm14, 1.0, %v626_v25  ;;  %v540_v59 = vld [vmem:[%s740_s3] ss:$0 sm:$0xff]  ;;  %vm461_vm14 = vcmask (!%p545_p5), 0  }
 0x141   : > { %v323_v60 = vpop.xlane.xlu1 %322  ;;  %v244_v0 = vpop.xlane.xlu0 %243 }
 0x142   : > { %vm324_vm8 = vcmp.eq.f32.partialorder %v321_v38, %v323_v60  ;;  %578 = vrcp.f32 %v244_v0  ;;  %v329_v24 = vcvt.f32.s32 %v323_v60 }
 0x143   : > { %v325_v62 = vsel %vm324_vm8, %v320_v61, inf }
 0x144   : > { %326 = vmin.xlane.f32.xlu1 %v325_v62  ;;  %v330_v38 = vshll.u32 %v329_v24, 16 }
 0x145   : > { %v250_v3 = vpop.xlane.xlu0 %249  ;;  %v247_v5 = vpop.xlane.xlu1 %246 }
 0x146   : > { %580 = vrcp.f32 %v247_v5 }
 0x147   : > { %582 = vrcp.f32 %v250_v3 }
 0x149   : > { %v253_v13 = vpop.xlane.xlu1 %252 }
 0x14a   : > { %584 = vrcp.f32 %v253_v13 }
 0x14c   : > { %v579_v23 = vpop.eup %578 }
 0x14d   : > { %vm386_vm3 = vcmp.gt.f32.partialorder %v579_v23, %v539_v58  ;;  %vm397_vm4 = vcmp.le.f32.partialorder %v579_v23, %v540_v59 }
 0x14e   : > { %vm401_vm8 = vmand %vm386_vm3, %vm397_vm4 }
 0x14f   : > { %v541_v0 = vsel %vm401_vm8, 1.0, %v626_v25 }
 0x150   : > { %v581_v40 = vpop.eup %580 }
 0x151   : > { %v583_v48 = vpop.eup %582  ;;  %vm387_vm1 = vcmp.gt.f32.partialorder %v581_v40, %v539_v58  ;;  %vm398_vm2 = vcmp.le.f32.partialorder %v581_v40, %v540_v59 }
 0x152   : > { %vm388_vm5 = vcmp.gt.f32.partialorder %v583_v48, %v539_v58  ;;  %vm399_vm6 = vcmp.le.f32.partialorder %v583_v48, %v540_v59  ;;  %vm402_vm7 = vmand %vm387_vm1, %vm398_vm2 }
 0x153   : > { %vm403_vm9 = vmand %vm388_vm5, %vm399_vm6  ;;  %v542_v62 = vsel %vm402_vm7, 1.0, %v626_v25 }
 0x154   : > { %v585_v53 = vpop.eup %584  ;;  %v543_v1 = vsel %vm403_vm9, 1.0, %v626_v25 }
 0x155   : > { %vm400_vm11 = vcmp.le.f32.partialorder %v585_v53, %v540_v59 }
 0x1c8   : > { %v282_v8 = vpop.xlane.xlu0 %281 }
 0x1c9   : > { %v283_v14 = vcvt.f32.s32 %v282_v8 }
 0x1cb   : > { %v286_v16 = vadd.s32 %v285_v7, %v283_v14 }
 0x1cc   : > { %v312_v9 = vpop.xlane.xlu0 %311 }
 0x1cd   : > { %vm336_vm10 = vcmp.eq.s32.totalorder %v286_v16, %v332_v15  ;;  %v297_v21 = vpop.xlane.xlu1 %296  ;;  %v313_v22 = vcvt.f32.s32 %v312_v9  ;;  %v413_v9 = vld [vmem:[#allocation2] sm:$0x1] }
 0x1ce   : > { %v530_v26 = vsel %vm336_vm10, 1.0, %v626_v25  ;;  %v298_v27 = vcvt.f32.s32 %v297_v21  ;;  %vm389_vm10 = vcmp.gt.f32.partialorder %v585_v53, %v539_v58 }
 0x1cf   : > { %v316_v31 = vadd.s32 %v315_v20, %v313_v22  ;;  %v371_v32 = vsub.f32 %v579_v23, %v530_v26 }
 0x1d0   : > { %v301_v33 = vadd.s32 %v300_v19, %v298_v27 }
 0x1d1   : > { %vm338_vm12 = vcmp.eq.s32.totalorder %v316_v31, %v334_v28  ;;  %v327_v36 = vpop.xlane.xlu1 %326  ;;  %v375_v37 = vmul.f32 %v535_v29, %v371_v32 }
 0x1d2   : > { %vm337_vm13 = vcmp.eq.s32.totalorder %v301_v33, %v333_v30  ;;  %v328_v39 = vcvt.f32.s32 %v327_v36  ;;  %v532_v42 = vsel %vm338_vm12, 1.0, %v626_v25  ;;  %vm404_vm12 = vmand %vm389_vm10, %vm400_vm11 }
 0x1d3   : > { %v531_v41 = vsel %vm337_vm13, 1.0, %v626_v25  ;;  %416 = vperm.xlu0 %568, %v375_v37   ;;  %v373_v50 = vsub.f32 %v583_v48, %v532_v42  ;;  %v544_v6 = vsel %vm404_vm12, 1.0, %v626_v25  ;;  %vm455_vm13 = vcmask (!%p545_p5), 1040384  }
 0x1d4   : > { %v331_v45 = vadd.s32 %v330_v38, %v328_v39  ;;  %v372_v46 = vsub.f32 %v581_v40, %v531_v41 }
 0x1d5   : > { %v377_v54 = vmul.f32 %v537_v52, %v373_v50 }
 0x1d6   : > { %vm339_vm15 = vcmp.eq.s32.totalorder %v331_v45, %v335_v43  ;;  %v376_v49 = vmul.f32 %v536_v44, %v372_v46 }
 0x1d7   : > { %v533_v51 = vsel %vm339_vm15, 1.0, %v626_v25 }
 0x1d8   : > { %421 = vperm.xlu1 %569, %v376_v49   ;;  %v374_v55 = vsub.f32 %v585_v53, %v533_v51 }
 0x1da   : > { %v378_v57 = vmul.f32 %v538_v56, %v374_v55 }
 0x1dc   : > { %426 = vperm.xlu1 %569, %v377_v54  }
 0x1e0   : > { %431 = vperm.xlu1 %569, %v378_v57  }
 0x252   : > { %v417_v61 = vpop.permute.xlu0 %416 }
 0x253   : > { %v434_v3 = vmul.f32 %v541_v0, %v417_v61 }
 0x257   : > { %v422_v60 = vpop.permute.xlu1 %421 }
 0x258   : > { %v435_v63 = vmul.f32 %v542_v62, %v422_v60 }
 0x25a   : > { %v438_v5 = vadd.f32 %v435_v63, %v434_v3 }
 0x25b   : > { %v427_v2 = vpop.permute.xlu1 %426 }
 0x25c   : > { %v436_v4 = vmul.f32 %v543_v1, %v427_v2 }
 0x25e   : > { %v439_v8 = vadd.f32 %v438_v5, %v436_v4 }
 0x25f   : > { %v432_v7 = vpop.permute.xlu1 %431 }
 0x260   : > { %v437_v10 = vmul.f32 %v544_v6, %v432_v7 }
 0x262   : > { %v440_v11 = vadd.f32 %v439_v8, %v437_v10 }
 0x264   : > { %v441_v12 = vrot.slane %v440_v11, 4 }
 0x266   : > { %v442_v13 = vadd.f32 %v441_v12, %v440_v11 }
 0x268   : > { %v443_v14 = vrot.slane %v442_v13, 2 }
 0x26a   : > { %v444_v15 = vadd.f32 %v443_v14, %v442_v13 }
 0x26c   : > { %v445_v16 = vrot.slane %v444_v15, 1  ;;  %452 = sbr.rel (%p545_p5) target bundleno = 782 (0x30e), region = 44 }
 0x26e   : > { %v446_v17 = vadd.f32 %v445_v16, %v444_v15 }
 0x270   : > { %v447_v18 = vadd.f32 %v446_v17, %v413_v9 }
 0x272   : > { %448 = vst [vmem:[#allocation2] sm:$0x1] %v447_v18 }
 0x279   : > { %v453_v19 = vld [vmem:[#allocation2] sm:$0x1] }
 0x27a   : > { %v454_v20 = vand.u32 2147483647, %v453_v19 }
 0x27c   : > { %v456_v21 = vsel %vm455_vm13, %v454_v20, 0.0 }
 0x27d   : > { %457 = vadd.xlane.f32.xlu0 %v456_v21 }
 0x30a   : > { %v458_v22 = vpop.xlane.xlu0 %457 }
 0x30b   : > { %v460_v23 = vmul.f32 0.014285714, %v458_v22 }
 0x30d   : > { %462 = vst.msk [vmem:[#allocation3] sm:$0x1] %vm461_vm14, %v460_v23 }
 0x30e PF: > { %p554_p6 = scmp.eq.s32.totalorder %s659_s16, 2  ;;  %s627_s30 = smov [#allocation3]  }
 0x30f   : > { %s470_s5 = sshll.u32 %s627_s30, 4  ;;  %s471_s5 = int_to_ptr.vmem [resolvable:$true] %s470_s5 }
 0x310   : > { %s586_s6 = scalar_lea.vmem %s471_s5, 16  ;;  %s592_s7 = scalar_lea.vmem %s471_s5, 32 }
 0x311   : > { %p587_p7 = scmp.ne.s32.totalorder %s471_s5, %s586_s6  ;;  %p593_p10 = scmp.lt.s32.totalorder %s471_s5, %s471_s5 }
 0x312   : > { %p594_p11 = scmp.lt.s32.totalorder %s592_s7, %s586_s6 }
 0x313   : > { %p588_p8 = pnand %p587_p7, %p554_p6 }
 0x314   : > { %p595_p12 = por %p594_p11, %p593_p10 }
 0x315   : > { %p589_p9 = pneg %p588_p8 }
 0x317   : > { %p596_p13 = pnand %p595_p12, %p589_p9 }
 0x319   : > { %599 = shalt.err (!%p596_p13)
}
 0x31a   : > { %s600_s10 = scalar_lea.hbm %s741_s4, 16 }
 0x31b   : > { %p601_p0 = scmp.ne.s32.totalorder %s741_s4, %s600_s10  ;;  %p606_p3 = scmp.lt.u32.totalorder %s600_s10, %s741_s4 }
 0x31d   : > { %p602_p1 = pnand %p601_p0, %p554_p6 }
 0x31f   : > { %p603_p2 = pneg %p602_p1 }
 0x321   : > { %p608_p4 = pnand %p606_p3, %p603_p2 }
 0x323   : > { %611 = shalt.err (!%p608_p4)
}
 0x324   : > { %551 = dma.vmem_to_hbm [thread:$0]  (%p554_p6), %s471_s5, 16, %s741_s4, [#allocation4]  }
 0x325   : > { %617 = dma.done.wait (%p554_p6), [#allocation4], 16  }
 0x326   : > { %619 = vsyncadd (%p554_p6), [#allocation4], 4294967280 }
 0x327 PF: > { %s15_s15 = sadd.s32 1, %s622_s15  }
 0x328   : > { %p12_p5 = scmp.ge.s32.totalorder %s15_s15, 5  }
 0x32a   :  { %14 = sbr.rel (!%p12_p5) target bundleno = 1 (0x1), region = 74 }
 0x331   :  { %483 = vsyncpa [#allocation4], 1 }
 0x332   :  { %485 = vsyncpa [#allocation4 + $0x1], 1 }

</bundles_post_ra>
